<compile_context>
chip_gen: v7x
topology: tpu7x:2x2x1
jax: 0.10.0
libtpu: 0.0.40
codegen_flags: <defaults>
</compile_context>

<pallas_src>
import functools

import jax
import jax.numpy as jnp
from jax.experimental import pallas as pl
from jax.experimental.pallas import tpu as pltpu


def _make_contrastive_kernel(temperature: float, mm_dtype, eps: float = 1e-12):
    inv_temp = 1.0 / temperature
    eps_sq = eps * eps

    def _normalize(x):
        # x / max(||x||, eps)  ==  x * rsqrt(max(||x||^2, eps^2))  (sqrt monotone)
        ssq = jnp.sum(x * x, axis=-1, keepdims=True)
        return x * jax.lax.rsqrt(jnp.maximum(ssq, eps_sq))

    def kernel(q_ref, k_ref, kdiag_ref, loss_ref, m_sc, l_sc):
        j = pl.program_id(1)
        nk = pl.num_programs(1)

        @pl.when(j == 0)
        def _():
            m_sc[...] = jnp.full_like(m_sc, -jnp.inf)
            l_sc[...] = jnp.zeros_like(l_sc)

        q = q_ref[...].astype(jnp.float32)
        k = k_ref[...].astype(jnp.float32)
        qn = _normalize(q)                      # (TQ, D) f32
        kn = _normalize(k)                      # (TK, D) f32

        # sim tile = qn @ kn^T / temperature; contract on the shared last dim so
        # no explicit transpose is materialized. Keep bf16 operands bf16 for
        # the MXU; accumulate in f32.
        s = jax.lax.dot_general(
            qn.astype(mm_dtype), kn.astype(mm_dtype),
            dimension_numbers=(((1,), (1,)), ((), ())),
            preferred_element_type=jnp.float32) * inv_temp   # (TQ, TK)

        # Online (streaming) logsumexp over key tiles.
        m_prev = m_sc[...]
        m_new = jnp.maximum(m_prev, jnp.max(s, axis=-1, keepdims=True))
        l_sc[...] = (l_sc[...] * jnp.exp(m_prev - m_new)
                     + jnp.sum(jnp.exp(s - m_new), axis=-1, keepdims=True))
        m_sc[...] = m_new

        @pl.when(j == nk - 1)
        def _():
            # Diagonal term: q_norm[r] . k_norm[r] / T, computed as a row-wise
            # dot against the key rows aligned with this query tile.
            kd = kdiag_ref[...].astype(jnp.float32)
            kdn = _normalize(kd)                              # (TQ, D)
            diag = jnp.sum(qn * kdn, axis=-1, keepdims=True) * inv_temp
            lse = m_sc[...] + jnp.log(l_sc[...])
            loss_ref[...] = lse - diag                        # per-row CE loss

    return kernel


def _pick_tile(n, candidates):
    for t in candidates:
        if n >= t and n % t == 0:
            return t
    return n  # fall back to a single full-axis block (always correct)


def contrastive_head_loss(query_embeds, key_embeds, temperature: float = 0.1,
                          tile_q=None, tile_k=None):
    """Pallas TPU implementation of ContrastiveHead.forward."""
    assert query_embeds.shape == key_embeds.shape
    n, d = query_embeds.shape

    # Tile sizes: multiples of the MXU/sublane granularity when N allows it,
    # sized to stay well inside the v7x 32 MiB scoped-VMEM default.
    # TODO(synk): pad ragged N (N not a multiple of 128) instead of falling
    # back to a single full-axis block for very large, non-divisible N.
    tq = tile_q if tile_q is not None else _pick_tile(n, (256, 128))
    tk = tile_k if tile_k is not None else _pick_tile(n, (512, 256, 128))
    nq, nk = n // tq, n // tk

    mm_dtype = (jnp.bfloat16 if query_embeds.dtype == jnp.bfloat16
                else jnp.float32)
    kernel = _make_contrastive_kernel(temperature, mm_dtype)

    per_row = pl.pallas_call(
        kernel,
        out_shape=jax.ShapeDtypeStruct((n, 1), jnp.float32),
        grid_spec=pltpu.PrefetchScalarGridSpec(
            num_scalar_prefetch=0,
            grid=(nq, nk),
            in_specs=[
                pl.BlockSpec((tq, d), lambda i, j: (i, 0)),   # query tile
                pl.BlockSpec((tk, d), lambda i, j: (j, 0)),   # key tile (streamed)
                pl.BlockSpec((tq, d), lambda i, j: (i, 0)),   # key rows for diag
            ],
            out_specs=pl.BlockSpec((tq, 1), lambda i, j: (i, 0)),
            scratch_shapes=[
                pltpu.VMEM((tq, 1), jnp.float32),   # running max
                pltpu.VMEM((tq, 1), jnp.float32),   # running sum(exp)
            ],
        ),
        compiler_params=pltpu.CompilerParams(
            dimension_semantics=("parallel", "arbitrary")),
    )(query_embeds, key_embeds, key_embeds)

    return jnp.mean(per_row)


def _reference_loss(q, k, temperature=0.1, eps=1e-12):
    """Plain-JAX reference mirroring the PyTorch module (for sanity check)."""
    qn = q / jnp.maximum(jnp.linalg.norm(q, axis=-1, keepdims=True), eps)
    kn = k / jnp.maximum(jnp.linalg.norm(k, axis=-1, keepdims=True), eps)
    sim = (qn @ kn.T) / temperature
    labels = jnp.arange(sim.shape[0])
    log_probs = jax.nn.log_softmax(sim, axis=-1)
    return -jnp.mean(log_probs[jnp.arange(sim.shape[0]), labels])


if __name__ == "__main__":
    # ContrastiveHead has no learnable parameters; only inputs are needed.
    key = jax.random.PRNGKey(0)
    kq, kk, kq2, kk2 = jax.random.split(key, 4)

    # 1) Small demo shape consistent with the module: (batch=8, embed_dim=32),
    #    single-tile path.
    N, D = 8, 32
    query_embeds = jax.random.normal(kq, (N, D), dtype=jnp.float32)
    key_embeds = jax.random.normal(kk, (N, D), dtype=jnp.float32)

    loss = contrastive_head_loss(query_embeds, key_embeds, temperature=0.1)
    loss = jax.block_until_ready(loss)
    ref = _reference_loss(query_embeds, key_embeds, temperature=0.1)
    assert jnp.allclose(loss, ref, atol=1e-4, rtol=1e-4), (loss, ref)

    # 2) Exercise the multi-tile online-logsumexp path (forced small tiles).
    N2, D2 = 32, 64
    q2 = jax.random.normal(kq2, (N2, D2), dtype=jnp.float32)
    k2 = jax.random.normal(kk2, (N2, D2), dtype=jnp.float32)
    loss2 = contrastive_head_loss(q2, k2, temperature=0.1, tile_q=8, tile_k=8)
    loss2 = jax.block_until_ready(loss2)
    ref2 = _reference_loss(q2, k2, temperature=0.1)
    assert jnp.allclose(loss2, ref2, atol=1e-4, rtol=1e-4), (loss2, ref2)

    print("KERNEL_OK")
</pallas_src>

<mosaic_0001>
module attributes {stable_mosaic.version = 11 : i64} {
  func.func @kernel(%arg0: i32, %arg1: i32, %arg2: memref<8x32xf32, #tpu.memory_space<vmem>>, %arg3: memref<8x32xf32, #tpu.memory_space<vmem>>, %arg4: memref<8x32xf32, #tpu.memory_space<vmem>>, %arg5: memref<8x1xf32, #tpu.memory_space<vmem>>, %arg6: memref<8x1xf32, #tpu.memory_space<vmem>>, %arg7: memref<8x1xf32, #tpu.memory_space<vmem>>) attributes {dimension_semantics = [#tpu.dimension_semantics<parallel>, #tpu.dimension_semantics<arbitrary>], iteration_bounds = array<i64: 1, 1>, scalar_prefetch = 0 : i64, scratch_operands = 2 : i64, tpu.core_type = #tpu.core_type<tc>, window_params = [{transform_indices = @transform_0, window_bounds = array<i64: 8, 32>}, {transform_indices = @transform_1, window_bounds = array<i64: 8, 32>}, {transform_indices = @transform_2, window_bounds = array<i64: 8, 32>}, {transform_indices = @transform_3, window_bounds = array<i64: 8, 1>}]} {
    %c0_i32 = arith.constant 0 : i32
    %0 = arith.cmpi eq, %arg1, %c0_i32 : i32
    %1 = arith.extui %0 : i1 to i32
    %c0_i32_0 = arith.constant 0 : i32
    %2 = arith.cmpi ne, %1, %c0_i32_0 : i32
    scf.if %2 {
      %cst_21 = arith.constant 0xFF800000 : f32
      %43 = vector.broadcast %cst_21 : f32 to vector<8x1xf32>
      %c0_22 = arith.constant 0 : index
      %c0_23 = arith.constant 0 : index
      %44 = vector.load %arg6[%c0_22, %c0_23] : memref<8x1xf32, #tpu.memory_space<vmem>>, vector<8x1xf32>
      tpu.vector_store %arg6[%c0_22, %c0_23], %43 {strides = array<i32>} : memref<8x1xf32, #tpu.memory_space<vmem>>, vector<8x1xf32>,
      %cst_24 = arith.constant 0.000000e+00 : f32
      %45 = vector.broadcast %cst_24 : f32 to vector<8x1xf32>
      %c0_25 = arith.constant 0 : index
      %c0_26 = arith.constant 0 : index
      %46 = vector.load %arg7[%c0_25, %c0_26] : memref<8x1xf32, #tpu.memory_space<vmem>>, vector<8x1xf32>
      tpu.vector_store %arg7[%c0_25, %c0_26], %45 {strides = array<i32>} : memref<8x1xf32, #tpu.memory_space<vmem>>, vector<8x1xf32>,
    } else {
    }
    %c0 = arith.constant 0 : index
    %c0_1 = arith.constant 0 : index
    %3 = vector.load %arg2[%c0, %c0_1] : memref<8x32xf32, #tpu.memory_space<vmem>>, vector<8x32xf32>
    %c0_2 = arith.constant 0 : index
    %c0_3 = arith.constant 0 : index
    %4 = vector.load %arg3[%c0_2, %c0_3] : memref<8x32xf32, #tpu.memory_space<vmem>>, vector<8x32xf32>
    %5 = arith.mulf %3, %3 : vector<8x32xf32>
    %cst = arith.constant dense<0.000000e+00> : vector<8xf32>
    %6 = vector.multi_reduction <add>, %5, %cst [1] : vector<8x32xf32> to vector<8xf32>
    %7 = vector.shape_cast %6 : vector<8xf32> to vector<8x1xf32>
    %cst_4 = arith.constant 1.000000e-24 : f32
    %8 = vector.broadcast %cst_4 : f32 to vector<8x1xf32>
    %9 = arith.maximumf %7, %8 : vector<8x1xf32>
    %10 = math.rsqrt %9 : vector<8x1xf32>
    %11 = vector.broadcast %10 : vector<8x1xf32> to vector<8x32xf32>
    %12 = arith.mulf %3, %11 : vector<8x32xf32>
    %13 = arith.mulf %4, %4 : vector<8x32xf32>
    %cst_5 = arith.constant dense<0.000000e+00> : vector<8xf32>
    %14 = vector.multi_reduction <add>, %13, %cst_5 [1] : vector<8x32xf32> to vector<8xf32>
    %15 = vector.shape_cast %14 : vector<8xf32> to vector<8x1xf32>
    %cst_6 = arith.constant 1.000000e-24 : f32
    %16 = vector.broadcast %cst_6 : f32 to vector<8x1xf32>
    %17 = arith.maximumf %15, %16 : vector<8x1xf32>
    %18 = math.rsqrt %17 : vector<8x1xf32>
    %19 = vector.broadcast %18 : vector<8x1xf32> to vector<8x32xf32>
    %20 = arith.mulf %4, %19 : vector<8x32xf32>
    %cst_7 = arith.constant dense<0.000000e+00> : vector<8x8xf32>
    %21 = tpu.matmul %12, %20, %cst_7 {dimension_numbers = #tpu.dot_dimension_numbers<[1], [1], [0], [0], [0, 0, 1, 0], [], []>} : vector<8x32xf32>, vector<8x32xf32>, vector<8x8xf32> -> vector<8x8xf32>
    %cst_8 = arith.constant 1.000000e+01 : f32
    %22 = vector.broadcast %cst_8 : f32 to vector<8x8xf32>
    %23 = arith.mulf %21, %22 : vector<8x8xf32>
    %c0_9 = arith.constant 0 : index
    %c0_10 = arith.constant 0 : index
    %24 = vector.load %arg6[%c0_9, %c0_10] : memref<8x1xf32, #tpu.memory_space<vmem>>, vector<8x1xf32>
    %cst_11 = arith.constant dense<0xFF800000> : vector<8xf32>
    %25 = vector.multi_reduction <maximumf>, %23, %cst_11 [1] : vector<8x8xf32> to vector<8xf32>
    %26 = vector.shape_cast %25 : vector<8xf32> to vector<8x1xf32>
    %27 = arith.maximumf %24, %26 : vector<8x1xf32>
    %c0_12 = arith.constant 0 : index
    %c0_13 = arith.constant 0 : index
    %28 = vector.load %arg7[%c0_12, %c0_13] : memref<8x1xf32, #tpu.memory_space<vmem>>, vector<8x1xf32>
    %29 = arith.subf %24, %27 : vector<8x1xf32>
    %30 = math.exp %29 : vector<8x1xf32>
    %31 = arith.mulf %28, %30 : vector<8x1xf32>
    %32 = vector.broadcast %27 : vector<8x1xf32> to vector<8x8xf32>
    %33 = arith.subf %23, %32 : vector<8x8xf32>
    %34 = math.exp %33 : vector<8x8xf32>
    %cst_14 = arith.constant dense<0.000000e+00> : vector<8xf32>
    %35 = vector.multi_reduction <add>, %34, %cst_14 [1] : vector<8x8xf32> to vector<8xf32>
    %36 = vector.shape_cast %35 : vector<8xf32> to vector<8x1xf32>
    %37 = arith.addf %31, %36 : vector<8x1xf32>
    %c0_15 = arith.constant 0 : index
    %c0_16 = arith.constant 0 : index
    %38 = vector.load %arg7[%c0_15, %c0_16] : memref<8x1xf32, #tpu.memory_space<vmem>>, vector<8x1xf32>
    tpu.vector_store %arg7[%c0_15, %c0_16], %37 {strides = array<i32>} : memref<8x1xf32, #tpu.memory_space<vmem>>, vector<8x1xf32>,
    %c0_17 = arith.constant 0 : index
    %c0_18 = arith.constant 0 : index
    %39 = vector.load %arg6[%c0_17, %c0_18] : memref<8x1xf32, #tpu.memory_space<vmem>>, vector<8x1xf32>
    tpu.vector_store %arg6[%c0_17, %c0_18], %27 {strides = array<i32>} : memref<8x1xf32, #tpu.memory_space<vmem>>, vector<8x1xf32>,
    %c0_i32_19 = arith.constant 0 : i32
    %40 = arith.cmpi eq, %arg1, %c0_i32_19 : i32
    %41 = arith.extui %40 : i1 to i32
    %c0_i32_20 = arith.constant 0 : i32
    %42 = arith.cmpi ne, %41, %c0_i32_20 : i32
    scf.if %42 {
      %c0_21 = arith.constant 0 : index
      %c0_22 = arith.constant 0 : index
      %43 = vector.load %arg4[%c0_21, %c0_22] : memref<8x32xf32, #tpu.memory_space<vmem>>, vector<8x32xf32>
      %44 = arith.mulf %43, %43 : vector<8x32xf32>
      %cst_23 = arith.constant dense<0.000000e+00> : vector<8xf32>
      %45 = vector.multi_reduction <add>, %44, %cst_23 [1] : vector<8x32xf32> to vector<8xf32>
      %46 = vector.shape_cast %45 : vector<8xf32> to vector<8x1xf32>
      %cst_24 = arith.constant 1.000000e-24 : f32
      %47 = vector.broadcast %cst_24 : f32 to vector<8x1xf32>
      %48 = arith.maximumf %46, %47 : vector<8x1xf32>
      %49 = math.rsqrt %48 : vector<8x1xf32>
      %50 = vector.broadcast %49 : vector<8x1xf32> to vector<8x32xf32>
      %51 = arith.mulf %43, %50 : vector<8x32xf32>
      %52 = arith.mulf %12, %51 : vector<8x32xf32>
      %cst_25 = arith.constant dense<0.000000e+00> : vector<8xf32>
      %53 = vector.multi_reduction <add>, %52, %cst_25 [1] : vector<8x32xf32> to vector<8xf32>
      %54 = vector.shape_cast %53 : vector<8xf32> to vector<8x1xf32>
      %cst_26 = arith.constant 1.000000e+01 : f32
      %55 = vector.broadcast %cst_26 : f32 to vector<8x1xf32>
      %56 = arith.mulf %54, %55 : vector<8x1xf32>
      %c0_27 = arith.constant 0 : index
      %c0_28 = arith.constant 0 : index
      %57 = vector.load %arg6[%c0_27, %c0_28] : memref<8x1xf32, #tpu.memory_space<vmem>>, vector<8x1xf32>
      %c0_29 = arith.constant 0 : index
      %c0_30 = arith.constant 0 : index
      %58 = vector.load %arg7[%c0_29, %c0_30] : memref<8x1xf32, #tpu.memory_space<vmem>>, vector<8x1xf32>
      %59 = math.log %58 : vector<8x1xf32>
      %60 = arith.addf %57, %59 : vector<8x1xf32>
      %61 = arith.subf %60, %56 : vector<8x1xf32>
      %c0_31 = arith.constant 0 : index
      %c0_32 = arith.constant 0 : index
      %62 = vector.load %arg5[%c0_31, %c0_32] : memref<8x1xf32, #tpu.memory_space<vmem>>, vector<8x1xf32>
      tpu.vector_store %arg5[%c0_31, %c0_32], %61 {strides = array<i32>} : memref<8x1xf32, #tpu.memory_space<vmem>>, vector<8x1xf32>,
    } else {
    }
    return
  }
  func.func @transform_0(%arg0: i32, %arg1: i32) -> (i32, i32) {
    %c0_i32 = arith.constant 0 : i32
    %c0_i32_0 = arith.constant 0 : i32
    return %arg0, %c0_i32 : i32, i32
  }
  func.func @transform_1(%arg0: i32, %arg1: i32) -> (i32, i32) {
    %c0_i32 = arith.constant 0 : i32
    %c0_i32_0 = arith.constant 0 : i32
    return %arg1, %c0_i32 : i32, i32
  }
  func.func @transform_2(%arg0: i32, %arg1: i32) -> (i32, i32) {
    %c0_i32 = arith.constant 0 : i32
    %c0_i32_0 = arith.constant 0 : i32
    return %arg0, %c0_i32 : i32, i32
  }
  func.func @transform_3(%arg0: i32, %arg1: i32) -> (i32, i32) {
    %c0_i32 = arith.constant 0 : i32
    %c0_i32_0 = arith.constant 0 : i32
    return %arg0, %c0_i32 : i32, i32
  }
}

</mosaic_0001>

<bundles_post_ra>
// kernel: tpu_custom_call.1
= control target key start
LH: loop header
LB: loop body
LE: loop exit
PB: predicated region body
PF: predicated region fallthrough
CT: control target
= control target key end

     0   :  { %8 = vsyncpa [#allocation5], 0  ;;  %s384_s0 = inlined_call_operand.hbm [shape: f32[8,32], index: 0, kind: input, shape index: {}]   ;;  %s385_s1 = inlined_call_operand.hbm [shape: f32[8,32], index: 1, kind: input, shape index: {}]   ;;  %s386_s2 = inlined_call_operand.hbm [shape: f32[8,32], index: 2, kind: input, shape index: {}]   ;;  %s387_s3 = inlined_call_operand.vmem [shape: f32[8,1], index: 3, kind: output, shape index: {}]  }
   0x1   :  { %9 = vsyncpa [#allocation7], 0  ;;  %s305_s12 = smov [#allocation6]   ;;  %s306_s14 = smov [#allocation4]  }
   0x2   :  { %s26_s13 = sshll.u32 %s305_s12, 4  ;;  %s16_s15 = sshll.u32 %s306_s14, 4  ;;  %s27_s13 = int_to_ptr.vmem [resolvable:$true] %s26_s13  ;;  %s17_s15 = int_to_ptr.vmem [resolvable:$true] %s16_s15 }
   0x3   :  { %s235_s18 = scalar_lea.hbm %s385_s1, 128 }
   0x4   :  { %p236_p0 = scmp.ne.s32.totalorder %s385_s1, %s235_s18  ;;  %p239_p1 = scmp.lt.u32.totalorder %s235_s18, %s385_s1 }
   0x6   :  { %p241_p2 = pnand %p239_p1, %p236_p0 }
   0x8   :  { %244 = shalt.err (!%p241_p2)
}
   0x9   :  { %s245_s23 = scalar_lea.vmem %s27_s13, 128  ;;  %p250_p4 = scmp.lt.s32.totalorder %s27_s13, %s27_s13 }
   0xa   :  { %p246_p3 = scmp.ne.s32.totalorder %s27_s13, %s245_s23  ;;  %p251_p5 = scmp.lt.s32.totalorder %s245_s23, %s245_s23 }
   0xc   :  { %p252_p6 = por %p251_p5, %p250_p4 }
   0xe   :  { %p253_p7 = pnand %p252_p6, %p246_p3 }
  0x10   :  { %256 = shalt.err (!%p253_p7)
}
  0x11   :  { %29 = dma.hbm_to_vmem [thread:$0]  %s385_s1, 128, %s27_s13, [#allocation7]  }
  0x12   :  { %s257_s28 = scalar_lea.hbm %s384_s0, 128 }
  0x13   :  { %p258_p8 = scmp.ne.s32.totalorder %s384_s0, %s257_s28  ;;  %p261_p9 = scmp.lt.u32.totalorder %s257_s28, %s384_s0 }
  0x15   :  { %p263_p10 = pnand %p261_p9, %p258_p8 }
  0x17   :  { %266 = shalt.err (!%p263_p10)
}
  0x18   :  { %s267_s6 = scalar_lea.vmem %s17_s15, 128  ;;  %p272_p12 = scmp.lt.s32.totalorder %s17_s15, %s17_s15 }
  0x19   :  { %p268_p11 = scmp.ne.s32.totalorder %s17_s15, %s267_s6  ;;  %p273_p13 = scmp.lt.s32.totalorder %s267_s6, %s267_s6 }
  0x1b   :  { %p274_p0 = por %p273_p13, %p272_p12 }
  0x1d   :  { %p275_p1 = pnand %p274_p0, %p268_p11 }
  0x1f   :  { %278 = shalt.err (!%p275_p1)
}
  0x20   :  { %19 = dma.hbm_to_vmem [thread:$0]  %s384_s0, 128, %s17_s15, [#allocation5]  }
  0x21   :  { %s307_s8 = smov [#allocation8]   ;;  %s279_s12 = scalar_lea.hbm %s386_s2, 128 }
  0x22   :  { %s36_s9 = sshll.u32 %s307_s8, 4  ;;  %p280_p2 = scmp.ne.s32.totalorder %s386_s2, %s279_s12  ;;  %s37_s9 = int_to_ptr.vmem [resolvable:$true] %s36_s9 }
  0x23   :  { %p283_p3 = scmp.lt.u32.totalorder %s279_s12, %s386_s2 }
  0x25   :  { %p285_p4 = pnand %p283_p3, %p280_p2 }
  0x27   :  { %288 = shalt.err (!%p285_p4)
}
  0x28   :  { %s289_s18 = scalar_lea.vmem %s37_s9, 128  ;;  %p294_p6 = scmp.lt.s32.totalorder %s37_s9, %s37_s9 }
  0x29   :  { %p290_p5 = scmp.ne.s32.totalorder %s37_s9, %s289_s18  ;;  %p295_p7 = scmp.lt.s32.totalorder %s289_s18, %s289_s18 }
  0x2b   :  { %p296_p8 = por %p295_p7, %p294_p6 }
  0x2d   :  { %p297_p9 = pnand %p296_p8, %p290_p5 }
  0x2f   :  { %300 = shalt.err (!%p297_p9)
}
  0x30   :  { %39 = dma.hbm_to_vmem [thread:$0]  %s386_s2, 128, %s37_s9, [#allocation7]  }
  0x31   :  { %301 = dma.done.wait [#allocation5], 128  }
  0x32   :  { %302 = vsyncadd [#allocation5], 4294967168 }
  0x33   :  { %303 = dma.done.wait [#allocation7], 256  }
  0x34   :  { %304 = vsyncadd [#allocation7], 4294967040  ;;  %v57_v0 = vld [vmem:[#allocation6] sm:$0xff]  ;;  %vm59_vm0 = vcmask 261120   ;;  %v56_v1 = vld [vmem:[#allocation4] sm:$0xff]  ;;  %vm53_vm1 = vcmask 7168  }
  0x35   :  { %v66_v2 = vmul.f32 %v57_v0, %v57_v0  ;;  %v58_v3 = vmul.f32 %v56_v1, %v56_v1  ;;  %v179_v4 = vld [vmem:[#allocation8] sm:$0xff]  ;;  %v308_v9 = vmov 0.0   ;;  %vm309_vm2 = vmmov 0  }
  0x36   :  { %v180_v7 = vmul.f32 %v179_v4, %v179_v4  ;;  %55 = vst.msk [vmem:[#allocation3] sm:$0xff] %vm53_vm1, %v308_v9  ;;  %209 = vmatprep.subr.mxu0 %v308_v9  ;;  %211 = vmatprep.mubr.msk.f32.mxu0 %vm309_vm2, %v308_v9  ;;  %v310_v18 = vmov -inf   ;;  %vm151_vm3 = vcmask 64512   ;;  %v311_v23 = vmov 0  }
  0x37   :  { %v67_v5 = vsel %vm59_vm0, %v66_v2, 0.0  ;;  %v60_v6 = vsel %vm59_vm0, %v58_v3, 0.0  ;;  %54 = vst.msk [vmem:[#allocation2] sm:$0xff] %vm53_vm1, %v310_v18  ;;  %221 = vset.pattern.permute.xlu1 %v311_v23  ;;  %222 = vset.pattern.permute.xlu0 %v311_v23 }
  0x38   :  { %68 = vadd.xlane.f32.xlu0 %v67_v5  ;;  %v181_v8 = vsel %vm59_vm0, %v180_v7, 0.0 }
  0x3c   :  { %61 = vadd.xlane.f32.xlu0 %v60_v6 }
  0x3d   :  { %v156_v41 = vld [vmem:[#allocation3] sm:$0xff] }
  0x3e   :  { %v150_v24 = vld [vmem:[#allocation2] sm:$0xff] }
  0x40   :  { %182 = vadd.xlane.f32.xlu0 %v181_v8 }
  0xc5   :  { %v69_v10 = vpop.xlane.xlu0 %68 }
  0xc6   :  { %v70_v11 = vmax.f32 %v69_v10, 1e-24 }
  0xc8   :  { %223 = vrsqrt.f32 %v70_v11 }
  0xc9   :  { %v62_v12 = vpop.xlane.xlu0 %61 }
  0xca   :  { %v63_v13 = vmax.f32 %v62_v12, 1e-24 }
  0xcc   :  { %225 = vrsqrt.f32 %v63_v13 }
  0xcd   :  { %v183_v28 = vpop.xlane.xlu0 %182 }
  0xce   :  { %v184_v29 = vmax.f32 %v183_v28, 1e-24 }
  0xd0   :  { %227 = vrsqrt.f32 %v184_v29 }
  0xd2   :  { %v224_v14 = vpop.eup %223 }
  0xd3   :  { %v72_v15 = vmul.f32 %v224_v14, %v57_v0 }
  0xd5   :  { %210 = vmatpush3.xpose.msk.msra.mxu0 %vm59_vm0, %v72_v15 }
  0xd6   :  { %v226_v16 = vpop.eup %225 }
  0xd7   :  { %v65_v17 = vmul.f32 %v226_v16, %v56_v1 }
  0xd9   :  { %212 = vmatmul.mubr.msk.f32.vlgmr.msra.gmra.mrb[0].mxu0 %vm59_vm0, %v65_v17 }
  0xda   :  { %v228_v33 = vpop.eup %227 }
  0xdb   :  { %v186_v34 = vmul.f32 %v228_v33, %v179_v4 }
  0xdd   :  { %v187_v37 = vmul.f32 %v186_v34, %v65_v17 }
  0xdf   :  { %v188_v38 = vsel %vm59_vm0, %v187_v37, 0.0 }
 0x1ac   :  { %v145_v19 = vpop.f32.mrb[0].mxu0 }
 0x1ad   :  { %v149_v20 = vmul.f32 10.0, %v145_v19  ;;  %v213_v21 = vpop.f32.mrb[1].mxu0 }
 0x1af   :  { %v152_v22 = vsel %vm151_vm3, %v149_v20, -inf }
 0x1b0   :  { %153 = vmax.xlane.f32.xlu1 %v152_v22 }
 0x23d   :  { %v154_v25 = vpop.xlane.xlu1 %153 }
 0x23e   :  { %v155_v26 = vmax.f32 %v150_v24, %v154_v25 }
 0x240   :  { %v157_v27 = vsub.f32 %v150_v24, %v155_v26  ;;  %175 = vst.msk [vmem:[#allocation2] sm:$0xff] %vm53_vm1, %v155_v26  ;;  %163 = vperm.xlu1 %221, %v155_v26  }
 0x242   :  { %v158_v39 = vmul.f32 1.442695, %v157_v27 }
 0x247   :  { %v192_v49 = vld [vmem:[#allocation2] sm:$0xff] }
 0x2bf   :  { %v164_v30 = vpop.permute.xlu1 %163 }
 0x2c0   :  { %v166_v31 = vsub.f32 %v149_v20, %v164_v30 }
 0x2c2   :  { %v167_v32 = vmul.f32 1.442695, %v166_v31 }
 0x2c4   :  { %229 = vpow2.f32 %v167_v32 }
 0x2c5   :  { %231 = vpow2.f32 %v158_v39 }
 0x2ce   :  { %v230_v35 = vpop.eup %229 }
 0x2cf   :  { %v169_v36 = vsel %vm151_vm3, %v230_v35, 0.0  ;;  %v232_v40 = vpop.eup %231 }
 0x2d0   :  { %170 = vadd.xlane.f32.xlu0 %v169_v36  ;;  %v160_v42 = vmul.f32 %v232_v40, %v156_v41 }
 0x2d4   :  { %189 = vadd.xlane.f32.xlu0 %v188_v38 }
 0x35d   :  { %v171_v43 = vpop.xlane.xlu0 %170 }
 0x35e   :  { %v172_v44 = vadd.f32 %v171_v43, %v160_v42 }
 0x360   :  { %174 = vst.msk [vmem:[#allocation3] sm:$0xff] %vm53_vm1, %v172_v44 }
 0x361   :  { %v190_v47 = vpop.xlane.xlu0 %189 }
 0x362   :  { %v191_v50 = vmul.f32 10.0, %v190_v47 }
 0x367   :  { %v193_v45 = vld [vmem:[#allocation3] sm:$0xff] }
 0x368   :  { %233 = vlog2.f32 %v193_v45 }
 0x372   :  { %v234_v46 = vpop.eup %233 }
 0x373   :  { %v195_v48 = vmul.f32 0.6931472, %v234_v46 }
 0x375   :  { %v196_v51 = vadd.f32 %v195_v48, %v192_v49 }
 0x377   :  { %v197_v52 = vsub.f32 %v196_v51, %v191_v50 }
 0x379   :  { %198 = vst.msk [vmem:[%s387_s3] sm:$0xff] %vm53_vm1, %v197_v52 }
 0x37a   :  { %203 = vsyncpa [#allocation5], 1 }
 0x37b   :  { %204 = vsyncpa [#allocation7], 1 }

</bundles_post_ra>
